<compile_context>
chip_gen: v6e
topology: v6e:2x2x1
jax: 0.10.0
libtpu: 0.0.40
codegen_flags: <defaults>
</compile_context>

<pallas_src>
import functools

import jax
import jax.numpy as jnp
from jax import lax
from jax.experimental import pallas as pl
from jax.experimental.pallas import tpu as pltpu


# ------------------------------------------------------------------------------------
# Weight packing for the fused shift-patch matmuls (wrapper-side, tiny tensors).
#
# Both convolutions are expressed as  out = W9 @ patch,  where `patch` stacks the nine
# spatial shifts (sy, sx) in {-1,0,1}^2 of a channel-major per-image source tile and
# W9 holds the conv taps (zeros where a (shift, parity) combination has no tap).
# ------------------------------------------------------------------------------------
def pack_down_weight(w_down):
    """Conv2d(k4,s2,p1) weight (inner, cin, 4, 4) -> (inner, 9*4*cin).

    Column index = shift*(4*cin) + (ry*2+rx)*cin + ci, shift = (sy+1)*3 + (sx+1),
    matching x supplied as rows x[n, ci, 2m+ry, 2nn+rx] and shifts (m+sy, nn+sx).
    """
    inner, cin = w_down.shape[0], w_down.shape[1]
    w9 = jnp.zeros((inner, 9, 4, cin), w_down.dtype)
    for ky in range(4):
        for kx in range(4):
            sy, ry = (ky - 1) // 2, (ky - 1) % 2        # ky = 2*sy + ry + 1
            sx, rx = (kx - 1) // 2, (kx - 1) % 2
            w9 = w9.at[:, (sy + 1) * 3 + (sx + 1), ry * 2 + rx, :].set(
                w_down[:, :, ky, kx])
    return w9.reshape(inner, 9 * 4 * cin)


def pack_up_weight(w_up):
    """ConvTranspose2d(k4,s2,p1) weight (inner, outer, 4, 4) -> (4*outer, 9*inner).

    Output row index = co*4 + (dy*2+dx)  (output-pixel parity phase).
    Column index     = shift*inner + ci, shift = (sy+1)*3 + (sx+1); taps a phase does
    not use stay zero (2.25x padded FLOPs -- free, MXU is far from its roofline here).
    """
    inner, outer = w_up.shape[0], w_up.shape[1]
    w9 = jnp.zeros((outer, 4, 9, inner), w_up.dtype)
    for dy in (0, 1):
        for dx in (0, 1):
            for sy in (-1, 0, 1):
                for sx in (-1, 0, 1):
                    ky, kx = dy + 1 - 2 * sy, dx + 1 - 2 * sx
                    if 0 <= ky < 4 and 0 <= kx < 4:
                        w9 = w9.at[:, dy * 2 + dx, (sy + 1) * 3 + (sx + 1), :].set(
                            w_up[:, :, ky, kx].T)
    return w9.reshape(outer * 4, 9 * inner)


# ------------------------------------------------------------------------------------
# Kernel A: per image -- LeakyReLU -> Conv2d (one matmul) -> ReLU -> ConvTranspose2d
#           (one fused 4-phase matmul) -> pre-BN activations + BN partial statistics.
# ------------------------------------------------------------------------------------
def down_up_stats_kernel(xd_ref, wd_ref, wu_ref, y2_ref, stats_ref,
                         xstage_ref, y1stage_ref, *, oh, ow, pad):
    m1 = oh * ow

    # Lane-validity masks for horizontal shifts only (vertical out-of-range reads land
    # in the zero halos of the staging buffers).
    col = lax.broadcasted_iota(jnp.int32, (1, m1), 1) % ow
    ok_left = col > 0            # shift reads column nn-1
    ok_right = col < (ow - 1)    # shift reads column nn+1

    def stage_and_patch(src, stage_ref):
        """Stage a (rows, m1) bf16 tile between zero halos; return the 9-shift patch."""
        rows = stage_ref.shape[0]
        # Zero only the halos -- the middle m1 columns are overwritten with real data.
        stage_ref[:, 0:pad] = jnp.zeros((rows, pad), jnp.bfloat16)
        stage_ref[:, pad + m1:pad + m1 + pad] = jnp.zeros((rows, pad), jnp.bfloat16)
        stage_ref[:, pad:pad + m1] = src
        pieces = []
        for sy in (-1, 0, 1):
            for sx in (-1, 0, 1):
                off = pad + sy * ow + sx                 # static slice start
                v = stage_ref[:, off:off + m1]
                if sx == -1:
                    v = jnp.where(ok_left, v, 0.0)
                elif sx == 1:
                    v = jnp.where(ok_right, v, 0.0)
                pieces.append(v)
        return jnp.concatenate(pieces, axis=0)           # (9*rows, m1) bf16

    # ---- down path: LeakyReLU(0.2) + Conv2d(k4,s2,p1) + ReLU -----------------------
    x = xd_ref[0]                                        # (4*cin, m1) bf16, rows=(ry,rx,ci)
    x = jnp.where(x >= 0, x, x * 0.2)                    # LeakyReLU(0.2)
    patch_x = stage_and_patch(x, xstage_ref)             # (36*cin, m1) bf16
    y1 = jnp.dot(wd_ref[...], patch_x, preferred_element_type=jnp.float32)
    y1 = jnp.maximum(y1, 0.0).astype(jnp.bfloat16)       # (inner, m1)

    # ---- up path: ConvTranspose2d(k4,s2,p1), all 4 output phases in one matmul -----
    patch_y1 = stage_and_patch(y1, y1stage_ref)          # (9*inner, m1) bf16
    y2 = jnp.dot(wu_ref[...], patch_y1, preferred_element_type=jnp.float32)
    # rows = co*4 + (dy*2+dx), lanes = m*ow + nn : pre-BN activations of this image.
    y2_ref[0] = y2

    # ---- BatchNorm partial statistics (per row = per (channel, phase)) -------------
    stats_ref[0] = jnp.concatenate(
        [jnp.sum(y2, axis=1, keepdims=True),
         jnp.sum(y2 * y2, axis=1, keepdims=True)], axis=1)     # (4*outer, 2) f32


# ------------------------------------------------------------------------------------
# Kernel B: BatchNorm finalize/apply  out = y2 * scale[c] + shift[c]   (fully parallel)
# ------------------------------------------------------------------------------------
def bn_apply_kernel(y2_ref, scale_ref, shift_ref, out_ref):
    out_ref[0] = y2_ref[0] * scale_ref[...] + shift_ref[...]


def _nbytes(shape, dtype):
    n = 1
    for s in shape:
        n *= int(s)
    return n * jnp.dtype(dtype).itemsize


# ------------------------------------------------------------------------------------
# Forward pass of the innermost UnetSkipConnectionBlock
# ------------------------------------------------------------------------------------
def unet_innermost_forward(x_nchw, w_down, w_up, gamma, beta, *, eps=1e-5):
    N, cin, H, W = x_nchw.shape
    inner_nc = w_down.shape[0]           # Conv2d weight:          (inner, cin, 4, 4)
    outer_nc = w_up.shape[1]             # ConvTranspose2d weight: (inner, outer, 4, 4)
    assert H % 2 == 0 and W % 2 == 0
    oh, ow = H // 2, W // 2
    m1 = oh * ow
    pad = ((ow + 1 + 127) // 128) * 128  # lane-aligned zero halo (>= ow+1)
    stage_w = m1 + 2 * pad

    # ---- wrapper glue: phase-blocked channel-major view of x (same bytes as x) -----
    # xd[n, (ry*2+rx)*cin + ci, m*ow + nn] = x[n, ci, 2m+ry, 2nn+rx]   (bf16 -> half DMA)
    xd = x_nchw.reshape(N, cin, oh, 2, ow, 2)
    xd = jnp.transpose(xd, (0, 3, 5, 1, 2, 4)).reshape(N, 4 * cin, m1)
    xd = xd.astype(jnp.bfloat16)

    wd9 = pack_down_weight(w_down).astype(jnp.bfloat16)      # (inner, 36*cin)
    wu9 = pack_up_weight(w_up).astype(jnp.bfloat16)          # (4*outer, 9*inner)

    # ---- kernel A: down conv + up conv + BN partial stats, grid over images --------
    vmem_a = (2 * (_nbytes((4 * cin, m1), jnp.bfloat16)
                   + _nbytes((inner_nc, 36 * cin), jnp.bfloat16)
                   + _nbytes((4 * outer_nc, 9 * inner_nc), jnp.bfloat16)
                   + _nbytes((4 * outer_nc, m1), jnp.float32)
                   + _nbytes((4 * outer_nc, 2), jnp.float32))
              + _nbytes((4 * cin, stage_w), jnp.bfloat16)
              + _nbytes((inner_nc, stage_w), jnp.bfloat16)
              + 2 * (_nbytes((36 * cin, m1), jnp.bfloat16)
                     + _nbytes((9 * inner_nc, m1), jnp.bfloat16)))
    vmem_a = min(int(1.5 * vmem_a) + (4 << 20), 48 << 20)

    kern_a = functools.partial(down_up_stats_kernel, oh=oh, ow=ow, pad=pad)
    y2_pre, stats = pl.pallas_call(
        kern_a,
        out_shape=(jax.ShapeDtypeStruct((N, 4 * outer_nc, m1), jnp.float32),
                   jax.ShapeDtypeStruct((N, 4 * outer_nc, 2), jnp.float32)),
        grid_spec=pltpu.PrefetchScalarGridSpec(
            num_scalar_prefetch=0,
            grid=(N,),
            in_specs=[
                pl.BlockSpec((1, 4 * cin, m1), lambda n: (n, 0, 0)),           # xd
                pl.BlockSpec((inner_nc, 36 * cin), lambda n: (0, 0)),          # wd9
                pl.BlockSpec((4 * outer_nc, 9 * inner_nc), lambda n: (0, 0)),  # wu9
            ],
            out_specs=[
                pl.BlockSpec((1, 4 * outer_nc, m1), lambda n: (n, 0, 0)),      # pre-BN
                pl.BlockSpec((1, 4 * outer_nc, 2), lambda n: (n, 0, 0)),       # partials
            ],
            scratch_shapes=[
                pltpu.VMEM((4 * cin, stage_w), jnp.bfloat16),    # x staging (+halos)
                pltpu.VMEM((inner_nc, stage_w), jnp.bfloat16),   # y1 staging (+halos)
            ],
        ),
        compiler_params=pltpu.CompilerParams(
            dimension_semantics=("parallel",),
            vmem_limit_bytes=vmem_a,
        ),
    )(xd, wd9, wu9)

    # ---- BatchNorm finalize (tiny XLA reduction over per-tile partials) ------------
    count = N * H * W
    psum = stats[:, :, 0].reshape(N, outer_nc, 4).sum(axis=(0, 2))
    psumsq = stats[:, :, 1].reshape(N, outer_nc, 4).sum(axis=(0, 2))
    mean = psum / count
    var = jnp.maximum(psumsq / count - mean * mean, 0.0)   # biased batch variance (f32)
    scale_c = gamma.astype(jnp.float32) * lax.rsqrt(var + eps)
    shift_c = beta.astype(jnp.float32) - mean * scale_c
    scale = jnp.repeat(scale_c, 4).reshape(4 * outer_nc, 1)   # per (channel, phase) row
    shift = jnp.repeat(shift_c, 4).reshape(4 * outer_nc, 1)

    # ---- kernel B: apply BN, fully parallel over images ----------------------------
    vmem_b = 2 * (2 * _nbytes((4 * outer_nc, m1), jnp.float32)
                  + 2 * _nbytes((4 * outer_nc, 1), jnp.float32))
    vmem_b = min(int(1.5 * vmem_b) + (4 << 20), 48 << 20)
    y2n = pl.pallas_call(
        bn_apply_kernel,
        out_shape=jax.ShapeDtypeStruct((N, 4 * outer_nc, m1), jnp.float32),
        grid_spec=pltpu.PrefetchScalarGridSpec(
            num_scalar_prefetch=0,
            grid=(N,),
            in_specs=[
                pl.BlockSpec((1, 4 * outer_nc, m1), lambda n: (n, 0, 0)),
                pl.BlockSpec((4 * outer_nc, 1), lambda n: (0, 0)),
                pl.BlockSpec((4 * outer_nc, 1), lambda n: (0, 0)),
            ],
            out_specs=pl.BlockSpec((1, 4 * outer_nc, m1), lambda n: (n, 0, 0)),
        ),
        compiler_params=pltpu.CompilerParams(
            dimension_semantics=("parallel",),
            vmem_limit_bytes=vmem_b,
        ),
    )(y2_pre, scale, shift)

    # ---- de-interleave phases back to NCHW; concat skip rows in the wrapper --------
    up = y2n.reshape(N, outer_nc, 2, 2, oh, ow)              # (n, co, dy, dx, m, nn)
    up = jnp.transpose(up, (0, 1, 4, 2, 5, 3)).reshape(N, outer_nc, H, W)
    # TODO(synk): running_mean/running_var buffer updates (module state) not modeled.
    return jnp.concatenate([x_nchw, up], axis=1)


# ------------------------------------------------------------------------------------
# Pure-JAX f32 reference (lax convs) for the correctness check
# ------------------------------------------------------------------------------------
def reference_forward(x_nchw, w_down, w_up, gamma, beta):
    h = jnp.where(x_nchw >= 0.0, x_nchw, 0.2 * x_nchw)
    h = lax.conv_general_dilated(h, w_down, (2, 2), ((1, 1), (1, 1)),
                                 dimension_numbers=("NCHW", "OIHW", "NCHW"))
    h = jnp.maximum(h, 0.0)
    w_eq = jnp.transpose(jnp.flip(w_up, axis=(2, 3)), (1, 0, 2, 3))
    h = lax.conv_general_dilated(h, w_eq, (1, 1), ((2, 2), (2, 2)),
                                 lhs_dilation=(2, 2),
                                 dimension_numbers=("NCHW", "OIHW", "NCHW"))
    mean = jnp.mean(h, axis=(0, 2, 3), keepdims=True)
    var = jnp.mean(jnp.square(h - mean), axis=(0, 2, 3), keepdims=True)
    h = (h - mean) * lax.rsqrt(var + 1e-5) * gamma.reshape(1, -1, 1, 1) \
        + beta.reshape(1, -1, 1, 1)
    return jnp.concatenate([x_nchw, h], axis=1)


if __name__ == "__main__":
    # innermost block: outer_nc=4, inner_nc=8, input_nc defaults to outer_nc
    outer_nc, inner_nc = 4, 8
    N, H, W = 2, 16, 16

    key = jax.random.PRNGKey(0)
    k_x, k_wd, k_wu, k_g, k_b = jax.random.split(key, 5)
    x = jax.random.normal(k_x, (N, outer_nc, H, W), dtype=jnp.float32)
    w_down = 0.1 * jax.random.normal(k_wd, (inner_nc, outer_nc, 4, 4), dtype=jnp.float32)
    w_up = 0.1 * jax.random.normal(k_wu, (inner_nc, outer_nc, 4, 4), dtype=jnp.float32)
    gamma = 1.0 + 0.1 * jax.random.normal(k_g, (outer_nc,), dtype=jnp.float32)
    beta = 0.1 * jax.random.normal(k_b, (outer_nc,), dtype=jnp.float32)

    fwd = jax.jit(unet_innermost_forward)
    out = jax.block_until_ready(fwd(x, w_down, w_up, gamma, beta))

    ref = reference_forward(x, w_down, w_up, gamma, beta)
    assert out.shape == (N, 2 * outer_nc, H, W), out.shape
    # Matmul operands are bf16 (per perf review) -> tolerance vs. the f32 reference is
    # loosened deliberately; BN statistics and all accumulation stay in f32.
    max_err = float(jnp.max(jnp.abs(out - ref)))
    assert jnp.allclose(out, ref, atol=5e-2, rtol=5e-2), max_err
    print("KERNEL_OK")
</pallas_src>

<mosaic_0001>
module attributes {stable_mosaic.version = 11 : i64} {
  func.func @down_up_stats_kernel(%arg0: i32, %arg1: memref<1x16x64xbf16, #tpu.memory_space<vmem>>, %arg2: memref<8x144xbf16, #tpu.memory_space<vmem>>, %arg3: memref<16x72xbf16, #tpu.memory_space<vmem>>, %arg4: memref<1x16x64xf32, #tpu.memory_space<vmem>>, %arg5: memref<1x16x2xf32, #tpu.memory_space<vmem>>, %arg6: memref<16x320xbf16, #tpu.memory_space<vmem>>, %arg7: memref<8x320xbf16, #tpu.memory_space<vmem>>) attributes {dimension_semantics = [#tpu.dimension_semantics<parallel>], iteration_bounds = array<i64: 2>, scalar_prefetch = 0 : i64, scratch_operands = 2 : i64, tpu.core_type = #tpu.core_type<tc>, window_params = [{transform_indices = @transform_0, window_bounds = array<i64: 1, 16, 64>}, {pipeline_mode = #tpu.pipeline_mode<synchronous>, transform_indices = @transform_1, window_bounds = array<i64: 8, 144>}, {pipeline_mode = #tpu.pipeline_mode<synchronous>, transform_indices = @transform_2, window_bounds = array<i64: 16, 72>}, {transform_indices = @transform_3, window_bounds = array<i64: 1, 16, 64>}, {transform_indices = @transform_4, window_bounds = array<i64: 1, 16, 2>}]} {
    %0 = tpu.iota {dimensions = array<i32: 1>} : vector<1x64xi32>
    %c8_i32 = arith.constant 8 : i32
    %c0_i32 = arith.constant 0 : i32
    %1 = arith.cmpi eq, %c8_i32, %c0_i32 : i32
    %c1_i32 = arith.constant 1 : i32
    %2 = arith.select %1, %c1_i32, %c8_i32 : i32
    %3 = vector.broadcast %2 : i32 to vector<1x64xi32>
    %4 = arith.remsi %0, %3 : vector<1x64xi32>
    %c0_i32_0 = arith.constant 0 : i32
    %5 = vector.broadcast %c0_i32_0 : i32 to vector<1x64xi32>
    %6 = arith.cmpi ne, %4, %5 : vector<1x64xi32>
    %c0_i32_1 = arith.constant 0 : i32
    %7 = vector.broadcast %c0_i32_1 : i32 to vector<1x64xi32>
    %8 = arith.cmpi slt, %4, %7 : vector<1x64xi32>
    %c0_i32_2 = arith.constant 0 : i32
    %9 = arith.cmpi slt, %2, %c0_i32_2 : i32
    %10 = vector.broadcast %9 : i1 to vector<1x64xi1>
    %11 = vector.broadcast %10 : vector<1x64xi1> to vector<1x64xi1>
    %12 = arith.xori %8, %11 : vector<1x64xi1>
    %13 = arith.andi %12, %6 : vector<1x64xi1>
    %14 = vector.broadcast %2 : i32 to vector<1x64xi32>
    %15 = arith.addi %4, %14 : vector<1x64xi32>
    %16 = arith.select %13, %15, %4 : vector<1x64xi1>, vector<1x64xi32>
    %c0_i32_3 = arith.constant 0 : i32
    %17 = vector.broadcast %c0_i32_3 : i32 to vector<1x64xi32>
    %18 = arith.cmpi sgt, %16, %17 : vector<1x64xi32>
    %c7_i32 = arith.constant 7 : i32
    %19 = vector.broadcast %c7_i32 : i32 to vector<1x64xi32>
    %20 = arith.cmpi slt, %16, %19 : vector<1x64xi32>
    %c0 = arith.constant 0 : index
    %c0_4 = arith.constant 0 : index
    %c0_5 = arith.constant 0 : index
    %21 = vector.load %arg1[%c0, %c0_4, %c0_5] : memref<1x16x64xbf16, #tpu.memory_space<vmem>>, vector<1x16x64xbf16>
    %22 = vector.shape_cast %21 : vector<1x16x64xbf16> to vector<16x64xbf16>
    %cst = arith.constant 0.000000e+00 : bf16
    %23 = vector.broadcast %cst : bf16 to vector<16x64xbf16>
    %24 = arith.cmpf oge, %22, %23 : vector<16x64xbf16>
    %cst_6 = arith.constant 2.001950e-01 : bf16
    %25 = vector.broadcast %cst_6 : bf16 to vector<16x64xbf16>
    %26 = arith.mulf %22, %25 : vector<16x64xbf16>
    %27 = arith.select %24, %22, %26 : vector<16x64xi1>, vector<16x64xbf16>
    %cst_7 = arith.constant 0.000000e+00 : bf16
    %28 = vector.broadcast %cst_7 : bf16 to vector<16x128xbf16>
    %c0_8 = arith.constant 0 : index
    %c0_9 = arith.constant 0 : index
    %29 = vector.load %arg6[%c0_8, %c0_9] : memref<16x320xbf16, #tpu.memory_space<vmem>>, vector<16x128xbf16>
    tpu.vector_store %arg6[%c0_8, %c0_9], %28 {strides = array<i32>} : memref<16x320xbf16, #tpu.memory_space<vmem>>, vector<16x128xbf16>,
    %cst_10 = arith.constant 0.000000e+00 : bf16
    %30 = vector.broadcast %cst_10 : bf16 to vector<16x128xbf16>
    %c0_11 = arith.constant 0 : index
    %c192 = arith.constant 192 : index
    %31 = vector.load %arg6[%c0_11, %c192] : memref<16x320xbf16, #tpu.memory_space<vmem>>, vector<16x128xbf16>
    tpu.vector_store %arg6[%c0_11, %c192], %30 {strides = array<i32>} : memref<16x320xbf16, #tpu.memory_space<vmem>>, vector<16x128xbf16>,
    %c0_12 = arith.constant 0 : index
    %c128 = arith.constant 128 : index
    %32 = vector.load %arg6[%c0_12, %c128] : memref<16x320xbf16, #tpu.memory_space<vmem>>, vector<16x64xbf16>
    tpu.vector_store %arg6[%c0_12, %c128], %27 {strides = array<i32>} : memref<16x320xbf16, #tpu.memory_space<vmem>>, vector<16x64xbf16>,
    %c0_13 = arith.constant 0 : index
    %c119 = arith.constant 119 : index
    %33 = vector.load %arg6[%c0_13, %c119] : memref<16x320xbf16, #tpu.memory_space<vmem>>, vector<16x64xbf16>
    %cst_14 = arith.constant 0.000000e+00 : f32
    %34 = arith.truncf %cst_14 : f32 to bf16
    %35 = vector.shape_cast %18 : vector<1x64xi1> to vector<1x64xi1>
    %36 = vector.broadcast %35 : vector<1x64xi1> to vector<16x64xi1>
    %37 = vector.broadcast %34 : bf16 to vector<16x64xbf16>
    %38 = arith.select %36, %33, %37 : vector<16x64xi1>, vector<16x64xbf16>
    %c0_15 = arith.constant 0 : index
    %c120 = arith.constant 120 : index
    %39 = vector.load %arg6[%c0_15, %c120] : memref<16x320xbf16, #tpu.memory_space<vmem>>, vector<16x64xbf16>
    %c0_16 = arith.constant 0 : index
    %c121 = arith.constant 121 : index
    %40 = vector.load %arg6[%c0_16, %c121] : memref<16x320xbf16, #tpu.memory_space<vmem>>, vector<16x64xbf16>
    %cst_17 = arith.constant 0.000000e+00 : f32
    %41 = arith.truncf %cst_17 : f32 to bf16
    %42 = vector.shape_cast %20 : vector<1x64xi1> to vector<1x64xi1>
    %43 = vector.broadcast %42 : vector<1x64xi1> to vector<16x64xi1>
    %44 = vector.broadcast %41 : bf16 to vector<16x64xbf16>
    %45 = arith.select %43, %40, %44 : vector<16x64xi1>, vector<16x64xbf16>
    %c0_18 = arith.constant 0 : index
    %c127 = arith.constant 127 : index
    %46 = vector.load %arg6[%c0_18, %c127] : memref<16x320xbf16, #tpu.memory_space<vmem>>, vector<16x64xbf16>
    %cst_19 = arith.constant 0.000000e+00 : f32
    %47 = arith.truncf %cst_19 : f32 to bf16
    %48 = vector.shape_cast %18 : vector<1x64xi1> to vector<1x64xi1>
    %49 = vector.broadcast %48 : vector<1x64xi1> to vector<16x64xi1>
    %50 = vector.broadcast %47 : bf16 to vector<16x64xbf16>
    %51 = arith.select %49, %46, %50 : vector<16x64xi1>, vector<16x64xbf16>
    %c0_20 = arith.constant 0 : index
    %c128_21 = arith.constant 128 : index
    %52 = vector.load %arg6[%c0_20, %c128_21] : memref<16x320xbf16, #tpu.memory_space<vmem>>, vector<16x64xbf16>
    %c0_22 = arith.constant 0 : index
    %c129 = arith.constant 129 : index
    %53 = vector.load %arg6[%c0_22, %c129] : memref<16x320xbf16, #tpu.memory_space<vmem>>, vector<16x64xbf16>
    %cst_23 = arith.constant 0.000000e+00 : f32
    %54 = arith.truncf %cst_23 : f32 to bf16
    %55 = vector.shape_cast %20 : vector<1x64xi1> to vector<1x64xi1>
    %56 = vector.broadcast %55 : vector<1x64xi1> to vector<16x64xi1>
    %57 = vector.broadcast %54 : bf16 to vector<16x64xbf16>
    %58 = arith.select %56, %53, %57 : vector<16x64xi1>, vector<16x64xbf16>
    %c0_24 = arith.constant 0 : index
    %c135 = arith.constant 135 : index
    %59 = vector.load %arg6[%c0_24, %c135] : memref<16x320xbf16, #tpu.memory_space<vmem>>, vector<16x64xbf16>
    %cst_25 = arith.constant 0.000000e+00 : f32
    %60 = arith.truncf %cst_25 : f32 to bf16
    %61 = vector.shape_cast %18 : vector<1x64xi1> to vector<1x64xi1>
    %62 = vector.broadcast %61 : vector<1x64xi1> to vector<16x64xi1>
    %63 = vector.broadcast %60 : bf16 to vector<16x64xbf16>
    %64 = arith.select %62, %59, %63 : vector<16x64xi1>, vector<16x64xbf16>
    %c0_26 = arith.constant 0 : index
    %c136 = arith.constant 136 : index
    %65 = vector.load %arg6[%c0_26, %c136] : memref<16x320xbf16, #tpu.memory_space<vmem>>, vector<16x64xbf16>
    %c0_27 = arith.constant 0 : index
    %c137 = arith.constant 137 : index
    %66 = vector.load %arg6[%c0_27, %c137] : memref<16x320xbf16, #tpu.memory_space<vmem>>, vector<16x64xbf16>
    %cst_28 = arith.constant 0.000000e+00 : f32
    %67 = arith.truncf %cst_28 : f32 to bf16
    %68 = vector.shape_cast %20 : vector<1x64xi1> to vector<1x64xi1>
    %69 = vector.broadcast %68 : vector<1x64xi1> to vector<16x64xi1>
    %70 = vector.broadcast %67 : bf16 to vector<16x64xbf16>
    %71 = arith.select %69, %66, %70 : vector<16x64xi1>, vector<16x64xbf16>
    %72 = tpu.concatenate %38, %39, %45, %51, %52, %58, %64, %65, %71 in 0 : vector<16x64xbf16>, vector<16x64xbf16>, vector<16x64xbf16>, vector<16x64xbf16>, vector<16x64xbf16>, vector<16x64xbf16>, vector<16x64xbf16>, vector<16x64xbf16>, vector<16x64xbf16> -> vector<144x64xbf16>
    %c0_29 = arith.constant 0 : index
    %c0_30 = arith.constant 0 : index
    %73 = vector.load %arg2[%c0_29, %c0_30] : memref<8x144xbf16, #tpu.memory_space<vmem>>, vector<8x144xbf16>
    %cst_31 = arith.constant dense<0.000000e+00> : vector<8x64xf32>
    %74 = tpu.matmul %73, %72, %cst_31 {dimension_numbers = #tpu.dot_dimension_numbers<[1], [0], [0], [1], [0, 0, 1, 1], [], []>} : vector<8x144xbf16>, vector<144x64xbf16>, vector<8x64xf32> -> vector<8x64xf32>
    %cst_32 = arith.constant 0.000000e+00 : f32
    %75 = vector.broadcast %cst_32 : f32 to vector<8x64xf32>
    %76 = arith.maximumf %74, %75 : vector<8x64xf32>
    %77 = arith.truncf %76 : vector<8x64xf32> to vector<8x64xbf16>
    %cst_33 = arith.constant 0.000000e+00 : bf16
    %78 = vector.broadcast %cst_33 : bf16 to vector<8x128xbf16>
    %c0_34 = arith.constant 0 : index
    %c0_35 = arith.constant 0 : index
    %79 = vector.load %arg7[%c0_34, %c0_35] : memref<8x320xbf16, #tpu.memory_space<vmem>>, vector<8x128xbf16>
    tpu.vector_store %arg7[%c0_34, %c0_35], %78 {strides = array<i32>} : memref<8x320xbf16, #tpu.memory_space<vmem>>, vector<8x128xbf16>,
    %cst_36 = arith.constant 0.000000e+00 : bf16
    %80 = vector.broadcast %cst_36 : bf16 to vector<8x128xbf16>
    %c0_37 = arith.constant 0 : index
    %c192_38 = arith.constant 192 : index
    %81 = vector.load %arg7[%c0_37, %c192_38] : memref<8x320xbf16, #tpu.memory_space<vmem>>, vector<8x128xbf16>
    tpu.vector_store %arg7[%c0_37, %c192_38], %80 {strides = array<i32>} : memref<8x320xbf16, #tpu.memory_space<vmem>>, vector<8x128xbf16>,
    %c0_39 = arith.constant 0 : index
    %c128_40 = arith.constant 128 : index
    %82 = vector.load %arg7[%c0_39, %c128_40] : memref<8x320xbf16, #tpu.memory_space<vmem>>, vector<8x64xbf16>
    tpu.vector_store %arg7[%c0_39, %c128_40], %77 {strides = array<i32>} : memref<8x320xbf16, #tpu.memory_space<vmem>>, vector<8x64xbf16>,
    %c0_41 = arith.constant 0 : index
    %c119_42 = arith.constant 119 : index
    %83 = vector.load %arg7[%c0_41, %c119_42] : memref<8x320xbf16, #tpu.memory_space<vmem>>, vector<8x64xbf16>
    %cst_43 = arith.constant 0.000000e+00 : f32
    %84 = arith.truncf %cst_43 : f32 to bf16
    %85 = vector.shape_cast %18 : vector<1x64xi1> to vector<1x64xi1>
    %86 = vector.broadcast %85 : vector<1x64xi1> to vector<8x64xi1>
    %87 = vector.broadcast %84 : bf16 to vector<8x64xbf16>
    %88 = arith.select %86, %83, %87 : vector<8x64xi1>, vector<8x64xbf16>
    %c0_44 = arith.constant 0 : index
    %c120_45 = arith.constant 120 : index
    %89 = vector.load %arg7[%c0_44, %c120_45] : memref<8x320xbf16, #tpu.memory_space<vmem>>, vector<8x64xbf16>
    %c0_46 = arith.constant 0 : index
    %c121_47 = arith.constant 121 : index
    %90 = vector.load %arg7[%c0_46, %c121_47] : memref<8x320xbf16, #tpu.memory_space<vmem>>, vector<8x64xbf16>
    %cst_48 = arith.constant 0.000000e+00 : f32
    %91 = arith.truncf %cst_48 : f32 to bf16
    %92 = vector.shape_cast %20 : vector<1x64xi1> to vector<1x64xi1>
    %93 = vector.broadcast %92 : vector<1x64xi1> to vector<8x64xi1>
    %94 = vector.broadcast %91 : bf16 to vector<8x64xbf16>
    %95 = arith.select %93, %90, %94 : vector<8x64xi1>, vector<8x64xbf16>
    %c0_49 = arith.constant 0 : index
    %c127_50 = arith.constant 127 : index
    %96 = vector.load %arg7[%c0_49, %c127_50] : memref<8x320xbf16, #tpu.memory_space<vmem>>, vector<8x64xbf16>
    %cst_51 = arith.constant 0.000000e+00 : f32
    %97 = arith.truncf %cst_51 : f32 to bf16
    %98 = vector.shape_cast %18 : vector<1x64xi1> to vector<1x64xi1>
    %99 = vector.broadcast %98 : vector<1x64xi1> to vector<8x64xi1>
    %100 = vector.broadcast %97 : bf16 to vector<8x64xbf16>
    %101 = arith.select %99, %96, %100 : vector<8x64xi1>, vector<8x64xbf16>
    %c0_52 = arith.constant 0 : index
    %c128_53 = arith.constant 128 : index
    %102 = vector.load %arg7[%c0_52, %c128_53] : memref<8x320xbf16, #tpu.memory_space<vmem>>, vector<8x64xbf16>
    %c0_54 = arith.constant 0 : index
    %c129_55 = arith.constant 129 : index
    %103 = vector.load %arg7[%c0_54, %c129_55] : memref<8x320xbf16, #tpu.memory_space<vmem>>, vector<8x64xbf16>
    %cst_56 = arith.constant 0.000000e+00 : f32
    %104 = arith.truncf %cst_56 : f32 to bf16
    %105 = vector.shape_cast %20 : vector<1x64xi1> to vector<1x64xi1>
    %106 = vector.broadcast %105 : vector<1x64xi1> to vector<8x64xi1>
    %107 = vector.broadcast %104 : bf16 to vector<8x64xbf16>
    %108 = arith.select %106, %103, %107 : vector<8x64xi1>, vector<8x64xbf16>
    %c0_57 = arith.constant 0 : index
    %c135_58 = arith.constant 135 : index
    %109 = vector.load %arg7[%c0_57, %c135_58] : memref<8x320xbf16, #tpu.memory_space<vmem>>, vector<8x64xbf16>
    %cst_59 = arith.constant 0.000000e+00 : f32
    %110 = arith.truncf %cst_59 : f32 to bf16
    %111 = vector.shape_cast %18 : vector<1x64xi1> to vector<1x64xi1>
    %112 = vector.broadcast %111 : vector<1x64xi1> to vector<8x64xi1>
    %113 = vector.broadcast %110 : bf16 to vector<8x64xbf16>
    %114 = arith.select %112, %109, %113 : vector<8x64xi1>, vector<8x64xbf16>
    %c0_60 = arith.constant 0 : index
    %c136_61 = arith.constant 136 : index
    %115 = vector.load %arg7[%c0_60, %c136_61] : memref<8x320xbf16, #tpu.memory_space<vmem>>, vector<8x64xbf16>
    %c0_62 = arith.constant 0 : index
    %c137_63 = arith.constant 137 : index
    %116 = vector.load %arg7[%c0_62, %c137_63] : memref<8x320xbf16, #tpu.memory_space<vmem>>, vector<8x64xbf16>
    %cst_64 = arith.constant 0.000000e+00 : f32
    %117 = arith.truncf %cst_64 : f32 to bf16
    %118 = vector.shape_cast %20 : vector<1x64xi1> to vector<1x64xi1>
    %119 = vector.broadcast %118 : vector<1x64xi1> to vector<8x64xi1>
    %120 = vector.broadcast %117 : bf16 to vector<8x64xbf16>
    %121 = arith.select %119, %116, %120 : vector<8x64xi1>, vector<8x64xbf16>
    %122 = tpu.concatenate %88, %89, %95, %101, %102, %108, %114, %115, %121 in 0 : vector<8x64xbf16>, vector<8x64xbf16>, vector<8x64xbf16>, vector<8x64xbf16>, vector<8x64xbf16>, vector<8x64xbf16>, vector<8x64xbf16>, vector<8x64xbf16>, vector<8x64xbf16> -> vector<72x64xbf16>
    %c0_65 = arith.constant 0 : index
    %c0_66 = arith.constant 0 : index
    %123 = vector.load %arg3[%c0_65, %c0_66] : memref<16x72xbf16, #tpu.memory_space<vmem>>, vector<16x72xbf16>
    %cst_67 = arith.constant dense<0.000000e+00> : vector<16x64xf32>
    %124 = tpu.matmul %123, %122, %cst_67 {dimension_numbers = #tpu.dot_dimension_numbers<[1], [0], [0], [1], [0, 0, 1, 1], [], []>} : vector<16x72xbf16>, vector<72x64xbf16>, vector<16x64xf32> -> vector<16x64xf32>
    %c0_68 = arith.constant 0 : index
    %c0_69 = arith.constant 0 : index
    %c0_70 = arith.constant 0 : index
    %125 = vector.load %arg4[%c0_68, %c0_69, %c0_70] : memref<1x16x64xf32, #tpu.memory_space<vmem>>, vector<1x16x64xf32>
    %126 = vector.shape_cast %125 : vector<1x16x64xf32> to vector<16x64xf32>
    %127 = vector.shape_cast %124 : vector<16x64xf32> to vector<1x16x64xf32>
    tpu.vector_store %arg4[%c0_68, %c0_69, %c0_70], %127 {strides = array<i32>} : memref<1x16x64xf32, #tpu.memory_space<vmem>>, vector<1x16x64xf32>,
    %cst_71 = arith.constant dense<0.000000e+00> : vector<16xf32>
    %128 = vector.multi_reduction <add>, %124, %cst_71 [1] : vector<16x64xf32> to vector<16xf32>
    %129 = vector.shape_cast %128 : vector<16xf32> to vector<16x1xf32>
    %130 = arith.mulf %124, %124 : vector<16x64xf32>
    %cst_72 = arith.constant dense<0.000000e+00> : vector<16xf32>
    %131 = vector.multi_reduction <add>, %130, %cst_72 [1] : vector<16x64xf32> to vector<16xf32>
    %132 = vector.shape_cast %131 : vector<16xf32> to vector<16x1xf32>
    %133 = tpu.concatenate %129, %132 in 1 : vector<16x1xf32>, vector<16x1xf32> -> vector<16x2xf32>
    %c0_73 = arith.constant 0 : index
    %c0_74 = arith.constant 0 : index
    %c0_75 = arith.constant 0 : index
    %134 = vector.load %arg5[%c0_73, %c0_74, %c0_75] : memref<1x16x2xf32, #tpu.memory_space<vmem>>, vector<1x16x2xf32>
    %135 = vector.shape_cast %134 : vector<1x16x2xf32> to vector<16x2xf32>
    %136 = vector.shape_cast %133 : vector<16x2xf32> to vector<1x16x2xf32>
    tpu.vector_store %arg5[%c0_73, %c0_74, %c0_75], %136 {strides = array<i32>} : memref<1x16x2xf32, #tpu.memory_space<vmem>>, vector<1x16x2xf32>,
    return
  }
  func.func @transform_0(%arg0: i32) -> (i32, i32, i32) {
    %c0_i32 = arith.constant 0 : i32
    %c0_i32_0 = arith.constant 0 : i32
    %c0_i32_1 = arith.constant 0 : i32
    return %arg0, %c0_i32, %c0_i32_0 : i32, i32, i32
  }
  func.func @transform_1(%arg0: i32) -> (i32, i32) {
    %c0_i32 = arith.constant 0 : i32
    %c0_i32_0 = arith.constant 0 : i32
    %c0_i32_1 = arith.constant 0 : i32
    return %c0_i32, %c0_i32_0 : i32, i32
  }
  func.func @transform_2(%arg0: i32) -> (i32, i32) {
    %c0_i32 = arith.constant 0 : i32
    %c0_i32_0 = arith.constant 0 : i32
    %c0_i32_1 = arith.constant 0 : i32
    return %c0_i32, %c0_i32_0 : i32, i32
  }
  func.func @transform_3(%arg0: i32) -> (i32, i32, i32) {
    %c0_i32 = arith.constant 0 : i32
    %c0_i32_0 = arith.constant 0 : i32
    %c0_i32_1 = arith.constant 0 : i32
    return %arg0, %c0_i32, %c0_i32_0 : i32, i32, i32
  }
  func.func @transform_4(%arg0: i32) -> (i32, i32, i32) {
    %c0_i32 = arith.constant 0 : i32
    %c0_i32_0 = arith.constant 0 : i32
    %c0_i32_1 = arith.constant 0 : i32
    return %arg0, %c0_i32, %c0_i32_0 : i32, i32, i32
  }
}

module attributes {stable_mosaic.version = 11 : i64} {
  func.func @bn_apply_kernel(%arg0: i32, %arg1: memref<1x16x64xf32, #tpu.memory_space<vmem>>, %arg2: memref<16x1xf32, #tpu.memory_space<vmem>>, %arg3: memref<16x1xf32, #tpu.memory_space<vmem>>, %arg4: memref<1x16x64xf32, #tpu.memory_space<vmem>>) attributes {dimension_semantics = [#tpu.dimension_semantics<parallel>], iteration_bounds = array<i64: 2>, scalar_prefetch = 0 : i64, scratch_operands = 0 : i64, tpu.core_type = #tpu.core_type<tc>, window_params = [{transform_indices = @transform_0, window_bounds = array<i64: 1, 16, 64>}, {pipeline_mode = #tpu.pipeline_mode<synchronous>, transform_indices = @transform_1, window_bounds = array<i64: 16, 1>}, {pipeline_mode = #tpu.pipeline_mode<synchronous>, transform_indices = @transform_2, window_bounds = array<i64: 16, 1>}, {transform_indices = @transform_3, window_bounds = array<i64: 1, 16, 64>}]} {
    %c0 = arith.constant 0 : index
    %c0_0 = arith.constant 0 : index
    %c0_1 = arith.constant 0 : index
    %0 = vector.load %arg1[%c0, %c0_0, %c0_1] : memref<1x16x64xf32, #tpu.memory_space<vmem>>, vector<1x16x64xf32>
    %1 = vector.shape_cast %0 : vector<1x16x64xf32> to vector<16x64xf32>
    %c0_2 = arith.constant 0 : index
    %c0_3 = arith.constant 0 : index
    %2 = vector.load %arg2[%c0_2, %c0_3] : memref<16x1xf32, #tpu.memory_space<vmem>>, vector<16x1xf32>
    %3 = vector.broadcast %2 : vector<16x1xf32> to vector<16x64xf32>
    %4 = arith.mulf %1, %3 : vector<16x64xf32>
    %c0_4 = arith.constant 0 : index
    %c0_5 = arith.constant 0 : index
    %5 = vector.load %arg3[%c0_4, %c0_5] : memref<16x1xf32, #tpu.memory_space<vmem>>, vector<16x1xf32>
    %6 = vector.broadcast %5 : vector<16x1xf32> to vector<16x64xf32>
    %7 = arith.addf %4, %6 : vector<16x64xf32>
    %c0_6 = arith.constant 0 : index
    %c0_7 = arith.constant 0 : index
    %c0_8 = arith.constant 0 : index
    %8 = vector.load %arg4[%c0_6, %c0_7, %c0_8] : memref<1x16x64xf32, #tpu.memory_space<vmem>>, vector<1x16x64xf32>
    %9 = vector.shape_cast %8 : vector<1x16x64xf32> to vector<16x64xf32>
    %10 = vector.shape_cast %7 : vector<16x64xf32> to vector<1x16x64xf32>
    tpu.vector_store %arg4[%c0_6, %c0_7, %c0_8], %10 {strides = array<i32>} : memref<1x16x64xf32, #tpu.memory_space<vmem>>, vector<1x16x64xf32>,
    return
  }
  func.func @transform_0(%arg0: i32) -> (i32, i32, i32) {
    %c0_i32 = arith.constant 0 : i32
    %c0_i32_0 = arith.constant 0 : i32
    %c0_i32_1 = arith.constant 0 : i32
    return %arg0, %c0_i32, %c0_i32_0 : i32, i32, i32
  }
  func.func @transform_1(%arg0: i32) -> (i32, i32) {
    %c0_i32 = arith.constant 0 : i32
    %c0_i32_0 = arith.constant 0 : i32
    %c0_i32_1 = arith.constant 0 : i32
    return %c0_i32, %c0_i32_0 : i32, i32
  }
  func.func @transform_2(%arg0: i32) -> (i32, i32) {
    %c0_i32 = arith.constant 0 : i32
    %c0_i32_0 = arith.constant 0 : i32
    %c0_i32_1 = arith.constant 0 : i32
    return %c0_i32, %c0_i32_0 : i32, i32
  }
  func.func @transform_3(%arg0: i32) -> (i32, i32, i32) {
    %c0_i32 = arith.constant 0 : i32
    %c0_i32_0 = arith.constant 0 : i32
    %c0_i32_1 = arith.constant 0 : i32
    return %arg0, %c0_i32, %c0_i32_0 : i32, i32, i32
  }
}

</mosaic_0001>

<bundles_post_ra>
// kernel: unet_innermost_forward.3
= control target key start
LH: loop header
LB: loop body
LE: loop exit
PB: predicated region body
PF: predicated region fallthrough
CT: control target
= control target key end

     0   :  { %s312_s12 = smov 0   ;;  %s341_s0 = inlined_call_operand.vmem [shape: f32[2,16,64], index: 0, kind: input, shape index: {}]   ;;  %s342_s1 = inlined_call_operand.vmem [shape: f32[16,1], index: 1, kind: input, shape index: {}]   ;;  %s343_s2 = inlined_call_operand.vmem [shape: f32[16,1], index: 2, kind: input, shape index: {}]   ;;  %s344_s3 = inlined_call_operand.vmem [shape: f32[2,16,64], index: 3, kind: output, shape index: {}]  }
   0x1 LB: > { %s259_s13 = sadd.s32 4294967295, %s289_s12   ;;  %p263_p0 = scmp.ge.s32.totalorder %s289_s12, 1  ;;  %s289_s12 = sphi %s312_s12, %s13_s12  }
   0x2   : > { %p137_p1 = scmp.lt.s32.totalorder %s289_s12, 3 }
   0x4   : > { %p138_p2 = pnand %p263_p0, %p137_p1 }
   0x5   : > { %p161_p3 = scmp.lt.s32.totalorder (!%p138_p2), %s259_s13, 1 }
   0x6   : > { %141 = sbr.rel (%p138_p2) target bundleno = 146 (0x92), region = 32 }
   0xb   : > { %v187_v0 = vld [vmem:[%s343_s2] sm:$0xff]  ;;  %v291_v2 = vmov 0   ;;  %v188_v3 = vld [vmem:[%s343_s2 + $0x8] sm:$0xff]  ;;  %s346_s13 = smov (!%p161_p3, %s259_s13), 1  ;;  %vm201_vm0 = vcmask 523264  }
   0xc   : > { %v173_v1 = vld [vmem:[%s342_s1] sm:$0xff]  ;;  %282 = vset.pattern.permute.xlu1 %v291_v2  ;;  %281 = vset.pattern.permute.xlu0 %v291_v2  ;;  %v174_v4 = vld [vmem:[%s342_s1 + $0x8] sm:$0xff]  ;;  %s270_s22 = sshll.u32 %s346_s13, 4 }
   0xd   : > { %191 = vperm.xlu1 %282, %v187_v0   ;;  %177 = vperm.xlu0 %281, %v173_v1   ;;  %s165_s25 = scalar_lea.vmem %s341_s0, %s270_s22  ;;  %s170_s28 = scalar_lea.vmem %s344_s3, %s270_s22 }
   0xe   : > { %v171_v5 = vld [vmem:[%s165_s25] sm:$0xff]  ;;  %v172_v9 = vld [vmem:[%s165_s25 + $0x8] sm:$0xff] }
  0x11   : > { %196 = vperm.xlu1 %282, %v188_v3   ;;  %182 = vperm.xlu0 %281, %v174_v4  }
  0x88   : > { %v192_v6 = vpop.permute.xlu1 %191  ;;  %v178_v7 = vpop.permute.xlu0 %177 }
  0x89   : > { %v185_v8 = vmul.f32 %v178_v7, %v171_v5 }
  0x8b   : > { %v199_v10 = vadd.f32 %v192_v6, %v185_v8 }
  0x8c   : > { %v183_v11 = vpop.permute.xlu0 %182  ;;  %v197_v13 = vpop.permute.xlu1 %196 }
  0x8d   : > { %202 = vst.msk [vmem:[%s170_s28] sm:$0xff] %vm201_vm0, %v199_v10  ;;  %v186_v12 = vmul.f32 %v183_v11, %v172_v9 }
  0x8f   : > { %v200_v14 = vadd.f32 %v197_v13, %v186_v12 }
  0x91   : > { %203 = vst.msk [vmem:[%s170_s28 + $0x8] sm:$0xff] %vm201_vm0, %v200_v14 }
  0x92 PF: > { %s13_s12 = sadd.s32 1, %s289_s12  }
  0x93   : > { %p10_p4 = scmp.ge.s32.totalorder %s13_s12, 4  }
  0x95   :  { %12 = sbr.rel (!%p10_p4) target bundleno = 1 (0x1), region = 62 }

// kernel: unet_innermost_forward.2
= control target key start
LH: loop header
LB: loop body
LE: loop exit
PB: predicated region body
PF: predicated region fallthrough
CT: control target
= control target key end

     0   :  { %s895_s15 = smov 0   ;;  %s1085_s0 = inlined_call_operand.vmem [shape: bf16[2,16,64], index: 0, kind: input, shape index: {}]   ;;  %s1086_s1 = inlined_call_operand.vmem [shape: bf16[8,144], index: 1, kind: input, shape index: {}]   ;;  %s1087_s2 = inlined_call_operand.vmem [shape: bf16[16,72], index: 2, kind: input, shape index: {}]   ;;  %s1088_s3 = inlined_call_operand.vmem [shape: f32[2,16,64], index: 3, kind: output, shape index: {0}]   ;;  %s1089_s4 = inlined_call_operand.vmem [shape: f32[2,16,2], index: 4, kind: output, shape index: {1}]  }
   0x1 LB: > { %s751_s16 = sadd.s32 4294967295, %s853_s15   ;;  %p755_p0 = scmp.ge.s32.totalorder %s853_s15, 1  ;;  %s853_s15 = sphi %s895_s15, %s15_s15  }
   0x2   : > { %p165_p1 = scmp.lt.s32.totalorder %s853_s15, 3 }
   0x4   : > { %p166_p2 = pnand %p755_p0, %p165_p1 }
   0x5   : > { %p196_p3 = scmp.lt.s32.totalorder (!%p166_p2), %s751_s16, 1  ;;  %s856_s21 = smov (!%p166_p2), 7  }
   0x6   : > { %169 = sbr.rel (%p166_p2) target bundleno = 1207 (0x4b7), region = 32  ;;  %s857_s22 = smov (!%p166_p2), 127  }
   0x7   : > { %s858_s23 = smov (!%p166_p2), 1   ;;  %s859_s24 = smov (!%p166_p2), 121  }
   0x8   : > { %s860_s25 = smov (!%p166_p2), 9   ;;  %s861_s26 = smov (!%p166_p2), 111  }
   0x9   : > { %s862_s27 = smov (!%p166_p2), 112   ;;  %s863_s28 = smov (!%p166_p2), 118  }
   0xa   : > { %s864_s29 = smov (!%p166_p2), 119   ;;  %s865_s30 = smov (!%p166_p2), 120  }
   0xb   : > { %v215_v0 = vlaneseq  ;;  %vm241_vm0 = vcmask 1043968   ;;  %vm242_vm1 = vcmask 523268   ;;  %v855_v1 = vmov 0   ;;  %s1093_s16 = smov (!%p196_p3, %s751_s16), 1  ;;  %s866_s5 = smov 126   ;;  %v379_v59 = vld [vmem:[%s1086_s1] sm:$0xff] }
   0xc   : > { %239 = vst [vmem:[#allocation2] sm:$0xf] %v855_v1  ;;  %240 = vst [vmem:[#allocation2 + $0xc] sm:$0xf] %v855_v1  ;;  %430 = vmatprep.subr.bf16.mxu0 %v855_v1  ;;  %s793_s17 = sshll.u32 %s1093_s16, 3  ;;  %vm246_vm7 = vcmask 519168   ;;  %v775_v61 = vcombine.high %v379_v59, %v379_v59 }
   0xd   : > { %472 = vst [vmem:[#allocation3] sm:$0xf] %v855_v1  ;;  %vm243_vm2 = vmor %vm242_vm1, %vm241_vm0  ;;  %v216_v2 = vand.u32 127, %v215_v0  ;;  %s200_s20 = scalar_lea.vmem %s1085_s0, %s793_s17  ;;  %vm278_vm10 = vcmask 1039360   ;;  %vm270_vm13 = vcmask 990208   ;;  %s867_s6 = smov 110  }
   0xe   : > { %244 = vst.msk [vmem:[#allocation2 + $0x4] sm:$0xff] %vm243_vm2, %v855_v1  ;;  %245 = vst.msk [vmem:[#allocation2 + $0x10] sm:$0xff] %vm243_vm2, %v855_v1  ;;  %v231_v6 = vld [vmem:[%s200_s20] sm:$0xf]  ;;  %v232_v7 = vld [vmem:[%s200_s20 + $0x4] sm:$0xf] }
   0xf   : > { %473 = vst.msk [vmem:[#allocation3 + $0x4] sm:$0xff] %vm243_vm2, %v855_v1  ;;  %v221_v3 = vand.u32 7, %v216_v2  ;;  %vm233_vm8 = vcmp.ge.bf16.partialorder %v231_v6, 0  ;;  %vm234_vm9 = vcmp.ge.bf16.partialorder %v232_v7, 0  ;;  %v235_v8 = vmul.bf16 1045249613, %v231_v6 }
  0x10   : > { %v236_v10 = vmul.bf16 1045249613, %v232_v7  ;;  %vm347_vm1 = vcmask 982016   ;;  %vm258_vm2 = vcmask 973824   ;;  %s794_s11 = sshll.u32 %s1093_s16, 4 }
  0x11   : > { %vm229_vm3 = vcmp.gt.s32.totalorder %v221_v3, 0  ;;  %vm912_vm4 = vcmp.lt.s32.totalorder %v221_v3, 7  ;;  %v237_v11 = vsel %vm233_vm8, %v231_v6, %v235_v8  ;;  %vm869_vm8 = vmmov 0   ;;  %s205_s14 = scalar_lea.vmem %s1088_s3, %s794_s11  ;;  %s210_s18 = scalar_lea.vmem %s1089_s4, %s794_s11 }
  0x12   : > { %vm253_vm5 = vmpackc.low %vm229_vm3, %vm229_vm3  ;;  %v238_v12 = vsel %vm234_vm9, %v232_v7, %v236_v10  ;;  %247 = vst.msk [vmem:[#allocation2 + $0x4] sm:$0xf] %vm246_vm7, %v237_v11  ;;  %vm333_vm3 = vcmask 1031168   ;;  %vm592_vm9 = vcmask 588800  }
  0x13   : > { %v254_v5 = vsel %vm253_vm5, 65537, %v855_v1  ;;  %vm265_vm6 = vmpackc.low %vm912_vm4, %vm912_vm4  ;;  %248 = vst.msk [vmem:[#allocation2 + $0x10] sm:$0xf] %vm246_vm7, %v238_v12  ;;  %vm426_vm5 = vcmask 130048  }
  0x14   : > { %290 = vrot.lane.b32.xlu0 %v254_v5, %s856_s21  ;;  %275 = vrot.lane.b32.xlu1 %v254_v5, %s857_s22  ;;  %v266_v9 = vsel %vm265_vm6, 65537, %v855_v1  ;;  %vm412_vm6 = vcmask 72704  }
  0x15   : > { %776 = vmatprep.mubr.msk.bf16.mxu0 %vm426_vm5, %v775_v61 }
  0x18   : > { %285 = vrot.lane.b32.xlu0 %v266_v9, %s858_s23  ;;  %267 = vrot.lane.b32.xlu1 %v266_v9, %s859_s24 }
  0x19   : > { %v283_v13 = vld [vmem:[#allocation2 + $0x4] sm:$0xf] }
  0x1a   : > { %v284_v14 = vld [vmem:[#allocation2 + $0x10] sm:$0xf]  ;;  %v937_v22 = vld [vmem:[#allocation2] sm:$0xff] }
  0x1b   : > { %v770_v15 = vcombine.low %v283_v13, %v284_v14  ;;  %v939_v23 = vld [vmem:[#allocation2 + $0xc] sm:$0xff] }
  0x1c   : > { %295 = vrot.lane.b32.xlu0 %v266_v9, %s860_s25  ;;  %v764_v40 = vcombine.low %v937_v22, %v939_v23  ;;  %v765_v44 = vcombine.high %v937_v22, %v939_v23 }
  0x1d   : > { %370 = vrot.lane.b32.xlu1 %v770_v15, %s861_s26 }
  0x86   : > { %v930_v16 = vpop.permute.xlu0 %290  ;;  %v276_v17 = vpop.permute.xlu1 %275 }
  0x87   : > { %vm292_vm11 = vcmp.ne.s16.totalorder %v930_v16, 0  ;;  %v277_v18 = vrot.slane %v276_v17, 4 }
  0x88   : > { %v293_v19 = vsel %vm292_vm11, %v283_v13, 0  ;;  %v294_v20 = vsel %vm292_vm11, %v284_v14, 0 }
  0x89   : > { %v772_v21 = vcombine.low %v293_v19, %v294_v20  ;;  %v942_v24 = vsel %vm278_vm10, %v277_v18, %v276_v17 }
  0x8a   : > { %v944_v25 = vpop.permute.xlu0 %285  ;;  %vm280_vm12 = vcmp.ne.s16.totalorder %v942_v24, 0  ;;  %v268_v26 = vpop.permute.xlu1 %267  ;;  %v868_v24 = vmov 0.0  }
  0x8b   : > { %vm287_vm14 = vcmp.ne.s16.totalorder %v944_v25, 0  ;;  %368 = vrot.lane.b32.xlu0 %v772_v21, %s862_s27  ;;  %v269_v27 = vrot.slane %v268_v26, 4  ;;  %v281_v30 = vsel %vm280_vm12, %v937_v22, 0  ;;  %v282_v31 = vsel %vm280_vm12, %v939_v23, 0  ;;  %802 = vmatprep.subr.bf16.mxu1 %v868_v24 }
  0x8c   : > { %v288_v28 = vsel %vm287_vm14, %v283_v13, 0  ;;  %v289_v29 = vsel %vm287_vm14, %v284_v14, 0  ;;  %v769_v34 = vcombine.high %v281_v30, %v282_v31  ;;  %v768_v39 = vcombine.low %v281_v30, %v282_v31  ;;  %812 = vmatprep.mubr.msk.bf16.mxu1 %vm869_vm8, %v868_v24 }
  0x8d   : > { %v771_v32 = vcombine.low %v288_v28, %v289_v29  ;;  %v959_v33 = vsel %vm270_vm13, %v269_v27, %v268_v26  ;;  %v774_v26 = vcombine.low %v379_v59, %v379_v59 }
  0x8e   : > { %vm272_vm15 = vcmp.ne.s16.totalorder %v959_v33, 0  ;;  %v970_v37 = vpop.permute.xlu0 %295 }
  0x8f   : > { %361 = vrot.lane.b32.xlu1 %v771_v32, %s863_s28  ;;  %354 = vrot.lane.b32.xlu0 %v770_v15, %s864_s29  ;;  %v273_v35 = vsel %vm272_vm15, %v937_v22, 0  ;;  %v274_v36 = vsel %vm272_vm15, %v939_v23, 0  ;;  %vm297_vm0 = vcmp.ne.s16.totalorder %v970_v37, 0  ;;  %v371_v46 = vpop.permute.xlu1 %370 }
  0x90   : > { %v767_v38 = vcombine.high %v273_v35, %v274_v36  ;;  %v298_v41 = vsel %vm297_vm0, %v283_v13, 0  ;;  %v299_v42 = vsel %vm297_vm0, %v284_v14, 0  ;;  %v766_v43 = vcombine.low %v273_v35, %v274_v36 }
  0x91   : > { %v773_v45 = vcombine.low %v298_v41, %v299_v42 }
  0x93   : > { %255 = vrot.lane.b32.xlu1 %v254_v5, %s864_s29  ;;  %345 = vrot.lane.b32.xlu0 %v769_v34, %s865_s30 }
  0x97   : > { %343 = vrot.lane.b32.xlu1 %v768_v39, %s865_s30  ;;  %331 = vrot.lane.b32.xlu0 %v767_v38, %s866_s5 }
  0x9b   : > { %329 = vrot.lane.b32.xlu1 %v766_v43, %s866_s5  ;;  %316 = vrot.lane.b32.xlu0 %v764_v40, %s857_s22 }
  0x9f   : > { %318 = vrot.lane.b32.xlu1 %v765_v44, %s857_s22  ;;  %377 = vrot.lane.b32.xlu0 %v773_v45, %s867_s6 }
  0xa3   : > { %408 = vrot.lane.b32.xlu1 %v371_v46, %s860_s25 }
  0xfd   : > { %v369_v47 = vpop.permute.xlu0 %368 }
  0xfe   : > { %406 = vrot.lane.b32.xlu0 %v369_v47, %s860_s25 }
 0x101   : > { %v362_v48 = vpop.permute.xlu1 %361  ;;  %v355_v49 = vpop.permute.xlu0 %354 }
 0x102   : > { %404 = vrot.lane.b32.xlu1 %v362_v48, %s860_s25  ;;  %402 = vrot.lane.b32.xlu0 %v355_v49, %s860_s25 }
 0x105   : > { %v256_v50 = vpop.permute.xlu1 %255  ;;  %v346_v51 = vpop.permute.xlu0 %345 }
 0x106   : > { %400 = vrot.lane.b32.xlu0 %v346_v51, %s860_s25  ;;  %v257_v52 = vrot.slane %v256_v50, 4 }
 0x108   : > { %v996_v56 = vsel %vm258_vm2, %v257_v52, %v256_v50 }
 0x109   : > { %v344_v53 = vpop.permute.xlu1 %343  ;;  %v332_v54 = vpop.permute.xlu0 %331  ;;  %vm260_vm4 = vcmp.ne.s16.totalorder %v996_v56, 0 }
 0x10a   : > { %v348_v55 = vsel %vm347_vm1, %v344_v53, %v346_v51  ;;  %396 = vrot.lane.b32.xlu0 %v332_v54, %s860_s25  ;;  %v261_v62 = vsel %vm260_vm4, %v937_v22, 0  ;;  %v262_v63 = vsel %vm260_vm4, %v939_v23, 0 }
 0x10b   : > { %398 = vrot.lane.b32.xlu1 %v348_v55, %s860_s25  ;;  %v763_v3 = vcombine.high %v261_v62, %v262_v63  ;;  %v762_v4 = vcombine.low %v261_v62, %v262_v63 }
 0x10d   : > { %v330_v57 = vpop.permute.xlu1 %329  ;;  %v317_v60 = vpop.permute.xlu0 %316 }
 0x10e   : > { %v334_v58 = vsel %vm333_vm3, %v330_v57, %v332_v54 }
 0x10f   : > { %394 = vrot.lane.b32.xlu1 %v334_v58, %s860_s25 }
 0x111   : > { %v319_v0 = vpop.permute.xlu1 %318  ;;  %v378_v6 = vpop.permute.xlu0 %377 }
 0x112   : > { %392 = vrot.lane.b32.xlu0 %v319_v0, %s860_s25  ;;  %v320_v2 = vsel %vm278_vm10, %v317_v60, %v319_v0 }
 0x113   : > { %390 = vrot.lane.b32.xlu1 %v320_v2, %s860_s25 }
 0x115   : > { %v409_v5 = vpop.permute.xlu1 %408 }
 0x116   : > { %388 = vrot.lane.b32.xlu0 %v763_v3, %s860_s25  ;;  %431 = vmatpush1.bf16.msra.mxu0 %v409_v5 }
 0x117   : > { %386 = vrot.lane.b32.xlu1 %v762_v4, %s860_s25  ;;  %432 = vmatprep.subr.bf16.mxu0 %v855_v1 }
 0x11b   : > { %410 = vrot.lane.b32.xlu1 %v378_v6, %s860_s25 }
 0x170   : > { %v407_v7 = vpop.permute.xlu0 %406 }
 0x171   : > { %433 = vmatpush1.bf16.msra.mxu0 %v407_v7 }
 0x172   : > { %434 = vmatprep.subr.bf16.mxu0 %v855_v1 }
 0x174   : > { %v405_v8 = vpop.permute.xlu1 %404  ;;  %v403_v9 = vpop.permute.xlu0 %402 }
 0x175   : > { %435 = vmatpush1.bf16.msra.mxu0 %v405_v8 }
 0x176   : > { %436 = vmatprep.subr.bf16.mxu0 %v855_v1 }
 0x178   : > { %v401_v10 = vpop.permute.xlu0 %400 }
 0x179   : > { %437 = vmatpush1.bf16.msra.mxu0 %v403_v9 }
 0x17a   : > { %438 = vmatprep.subr.bf16.mxu0 %v855_v1 }
 0x17c   : > { %v397_v13 = vpop.permute.xlu0 %396 }
 0x17d   : > { %v399_v11 = vpop.permute.xlu1 %398 }
 0x17e   : > { %v416_v12 = vsel %vm412_vm6, %v399_v11, %v401_v10 }
 0x17f   : > { %439 = vmatpush1.bf16.msra.mxu0 %v416_v12 }
 0x180   : > { %440 = vmatprep.subr.bf16.mxu0 %v855_v1 }
 0x181   : > { %v395_v14 = vpop.permute.xlu1 %394 }
 0x182   : > { %v415_v15 = vsel %vm412_vm6, %v395_v14, %v397_v13 }
 0x183   : > { %441 = vmatpush1.bf16.msra.mxu0 %v415_v15 }
 0x184   : > { %v393_v17 = vpop.permute.xlu0 %392  ;;  %442 = vmatprep.subr.bf16.mxu0 %v855_v1 }
 0x185   : > { %v391_v18 = vpop.permute.xlu1 %390 }
 0x186   : > { %v414_v19 = vsel %vm412_vm6, %v391_v18, %v393_v17  ;;  %v846_v18 = vld [vmem:[%s1087_s2] sm:$0xff]  }
 0x187   : > { %443 = vmatpush1.bf16.msra.mxu0 %v414_v19 }
 0x188   : > { %v389_v20 = vpop.permute.xlu0 %388  ;;  %444 = vmatprep.subr.bf16.mxu0 %v855_v1 }
 0x189   : > { %v387_v21 = vpop.permute.xlu1 %386 }
 0x18a   : > { %v413_v22 = vsel %vm412_vm6, %v387_v21, %v389_v20 }
 0x18b   : > { %445 = vmatpush1.bf16.msra.mxu0 %v413_v22 }
 0x18c   : > { %460 = vmatprep.subr.bf16.mxu0 %v855_v1 }
 0x18d   : > { %v411_v23 = vpop.permute.xlu1 %410 }
 0x18f   : > { %461 = vmatpush2.bf16.msra.mxu0 %v411_v23 }
 0x192   : > { %463 = vmatmul.mubr.bf16.vlgmr.msra.gmra.mxu0 %v774_v26 }
 0x252   : > { %v464_v27 = vpop.f32.mrf.mxu0 }
 0x253   : > { %v470_v28 = vmax.f32 %v464_v27, 0.0 }
 0x254   : > { %v466_v29 = vpop.f32.mrf.mxu0 }
 0x255   : > { %v471_v30 = vpack.c.bf16 %v470_v28, %v470_v28 }
 0x256   : > { %v467_v31 = vpop.f32.mrf.mxu0 }
 0x257   : > { %474 = vst.msk [vmem:[#allocation3 + $0x4] sm:$0xf] %vm246_vm7, %v471_v30  ;;  %vm540_vm7 = vcmask 1043456  }
 0x258   : > { %v468_v32 = vpop.f32.mrf.mxu0 }
 0x25e   : > { %v479_v34 = vld [vmem:[#allocation3 + $0x4] sm:$0xf] }
 0x25f   : > { %v785_v35 = vcombine.low %v479_v34, %v479_v34  ;;  %v482_v36 = vsel %vm297_vm0, %v479_v34, 0  ;;  %v481_v1 = vsel %vm292_vm11, %v479_v34, 0  ;;  %v475_v38 = vld [vmem:[#allocation3] sm:$0xff]  ;;  %v480_v41 = vsel %vm287_vm14, %v479_v34, 0 }
 0x260   : > { %v788_v39 = vcombine.low %v482_v36, %v482_v36  ;;  %v787_v40 = vcombine.low %v481_v1, %v481_v1  ;;  %v477_v42 = vsel %vm272_vm15, %v475_v38, 0  ;;  %v786_v37 = vcombine.low %v480_v41, %v480_v41 }
 0x261   : > { %521 = vrot.lane.b32.xlu1 %v785_v35, %s864_s29  ;;  %533 = vrot.lane.b32.xlu0 %v785_v35, %s861_s26  ;;  %v781_v16 = vcombine.low %v477_v42, %v477_v42  ;;  %v478_v43 = vsel %vm280_vm12, %v475_v38, 0  ;;  %v782_v44 = vcombine.high %v477_v42, %v477_v42  ;;  %v779_v33 = vcombine.low %v475_v38, %v475_v38 }
 0x262   : > { %v783_v45 = vcombine.low %v478_v43, %v478_v43  ;;  %v784_v25 = vcombine.high %v478_v43, %v478_v43  ;;  %v780_v46 = vcombine.high %v475_v38, %v475_v38  ;;  %v476_v59 = vsel %vm260_vm4, %v475_v38, 0 }
 0x263   : > { %v778_v0 = vcombine.high %v476_v59, %v476_v59  ;;  %v777_v4 = vcombine.low %v476_v59, %v476_v59  ;;  %vm657_vm11 = vcmask 7168   ;;  %vm660_vm12 = vcmask 15360  }
 0x265   : > { %538 = vrot.lane.b32.xlu0 %v788_v39, %s867_s6  ;;  %531 = vrot.lane.b32.xlu1 %v787_v40, %s862_s27 }
 0x269   : > { %526 = vrot.lane.b32.xlu0 %v786_v37, %s863_s28  ;;  %503 = vrot.lane.b32.xlu1 %v781_v16, %s866_s5 }
 0x26d   : > { %505 = vrot.lane.b32.xlu0 %v782_v44, %s866_s5  ;;  %513 = vrot.lane.b32.xlu1 %v783_v45, %s865_s30 }
 0x271   : > { %515 = vrot.lane.b32.xlu0 %v784_v25, %s865_s30  ;;  %493 = vrot.lane.b32.xlu1 %v779_v33, %s857_s22 }
 0x275   : > { %495 = vrot.lane.b32.xlu0 %v780_v46, %s857_s22 }
 0x2d3   : > { %v522_v47 = vpop.permute.xlu1 %521  ;;  %v534_v48 = vpop.permute.xlu0 %533 }
 0x2d7   : > { %v539_v49 = vpop.permute.xlu0 %538  ;;  %v532_v50 = vpop.permute.xlu1 %531 }
 0x2d8   : > { %584 = vrot.lane.b32.xlu1 %v539_v49, %s860_s25  ;;  %v558_v51 = vsel %vm540_vm7, %v532_v50, %v534_v48 }
 0x2d9   : > { %582 = vrot.lane.b32.xlu0 %v558_v51, %s860_s25 }
 0x2db   : > { %v527_v52 = vpop.permute.xlu0 %526  ;;  %v504_v53 = vpop.permute.xlu1 %503 }
 0x2dc   : > { %v555_v54 = vsel %vm540_vm7, %v522_v47, %v527_v52 }
 0x2dd   : > { %580 = vrot.lane.b32.xlu1 %v555_v54, %s860_s25 }
 0x2df   : > { %v506_v55 = vpop.permute.xlu0 %505  ;;  %v514_v57 = vpop.permute.xlu1 %513 }
 0x2e0   : > { %v507_v60 = vsel %vm333_vm3, %v504_v53, %v506_v55 }
 0x2e3   : > { %v516_v58 = vpop.permute.xlu0 %515  ;;  %v494_v2 = vpop.permute.xlu1 %493 }
 0x2e4   : > { %v517_v61 = vsel %vm347_vm1, %v514_v57, %v516_v58  ;;  %v552_v62 = vsel %vm540_vm7, %v506_v55, %v516_v58 }
 0x2e5   : > { %578 = vrot.lane.b32.xlu1 %v552_v62, %s860_s25  ;;  %v549_v63 = vsel %vm540_vm7, %v507_v60, %v517_v61 }
 0x2e6   : > { %576 = vrot.lane.b32.xlu0 %v549_v63, %s860_s25 }
 0x2e7   : > { %v496_v3 = vpop.permute.xlu0 %495 }
 0x2e8   : > { %v497_v5 = vsel %vm278_vm10, %v494_v2, %v496_v3  ;;  %v546_v56 = vsel %vm540_vm7, %v778_v0, %v496_v3  ;;  %vm640_vm10 = vcmask 523264  }
 0x2e9   : > { %574 = vrot.lane.b32.xlu1 %v546_v56, %s860_s25  ;;  %v543_v6 = vsel %vm540_vm7, %v777_v4, %v497_v5 }
 0x2ea   : > { %572 = vrot.lane.b32.xlu0 %v543_v6, %s860_s25 }
 0x34a   : > { %v585_v7 = vpop.permute.xlu1 %584 }
 0x34b   : > { %v597_v8 = vsel %vm540_vm7, %v585_v7, 0  ;;  %v583_v9 = vpop.permute.xlu0 %582 }
 0x34c   : > { %803 = vmatpush3.bf16.msra.mxu1 %v597_v8 }
 0x34d   : > { %804 = vmatprep.subr.bf16.mxu1 %v868_v24 }
 0x34f   : > { %v581_v10 = vpop.permute.xlu1 %580 }
 0x350   : > { %805 = vmatpush3.bf16.msra.mxu1 %v583_v9 }
 0x351   : > { %806 = vmatprep.subr.bf16.mxu1 %v868_v24 }
 0x354   : > { %807 = vmatpush3.bf16.msra.mxu1 %v581_v10 }
 0x355   : > { %808 = vmatprep.subr.bf16.mxu1 %v868_v24 }
 0x357   : > { %v579_v11 = vpop.permute.xlu1 %578 }
 0x358   : > { %v577_v12 = vpop.permute.xlu0 %576 }
 0x359   : > { %v587_v13 = vsel %vm412_vm6, %v577_v12, %v579_v11 }
 0x35a   : > { %809 = vmatpush3.bf16.msra.mxu1 %v587_v13 }
 0x35b   : > { %v575_v14 = vpop.permute.xlu1 %574  ;;  %810 = vmatprep.subr.bf16.mxu1 %v868_v24 }
 0x35c   : > { %v573_v15 = vpop.permute.xlu0 %572 }
 0x35d   : > { %v586_v17 = vsel %vm412_vm6, %v573_v15, %v575_v14 }
 0x35e   : > { %811 = vmatpush3.bf16.msra.mxu1 %v586_v17 }
 0x361   : > { %813 = vmatmul.mubr.msk.bf16.vlgmr.msra.gmra.mxu1 %vm592_vm9, %v846_v18 }
 0x421   : > { %v633_v19 = vpop.f32.mrf.mxu1 }
 0x422   : > { %641 = vst.msk [vmem:[%s205_s14] sm:$0xff] %vm640_vm10, %v633_v19  ;;  %v643_v20 = vsel %vm640_vm10, %v633_v19, 0.0  ;;  %v649_v21 = vmul.f32 %v633_v19, %v633_v19 }
 0x423   : > { %644 = vadd.xlane.f32.xlu0 %v643_v20  ;;  %v814_v22 = vpop.f32.mrf.mxu1 }
 0x424   : > { %v651_v26 = vsel %vm640_vm10, %v649_v21, 0.0 }
 0x425   : > { %v636_v23 = vpop.f32.mrf.mxu1 }
 0x426   : > { %642 = vst.msk [vmem:[%s205_s14 + $0x8] sm:$0xff] %vm640_vm10, %v636_v23  ;;  %v646_v27 = vsel %vm640_vm10, %v636_v23, 0.0  ;;  %v650_v28 = vmul.f32 %v636_v23, %v636_v23 }
 0x427   : > { %652 = vadd.xlane.f32.xlu0 %v651_v26  ;;  %647 = vadd.xlane.f32.xlu1 %v646_v27  ;;  %v815_v29 = vpop.f32.mrf.mxu1 }
 0x428   : > { %v654_v30 = vsel %vm640_vm10, %v650_v28, 0.0 }
 0x42b   : > { %655 = vadd.xlane.f32.xlu0 %v654_v30 }
 0x4ac   : > { %v645_v31 = vpop.xlane.xlu0 %644 }
 0x4b0   : > { %v653_v32 = vpop.xlane.xlu0 %652  ;;  %v648_v35 = vpop.xlane.xlu1 %647 }
 0x4b1   : > { %v658_v34 = vsel %vm657_vm11, %v645_v31, %v653_v32 }
 0x4b2   : > { %661 = vst.msk [vmem:[%s210_s18] sm:$0xff] %vm660_vm12, %v658_v34 }
 0x4b4   : > { %v656_v36 = vpop.xlane.xlu0 %655 }
 0x4b5   : > { %v659_v1 = vsel %vm657_vm11, %v648_v35, %v656_v36 }
 0x4b6   : > { %662 = vst.msk [vmem:[%s210_s18 + $0x8] sm:$0xff] %vm660_vm12, %v659_v1 }
 0x4b7 PF: > { %s15_s15 = sadd.s32 1, %s853_s15  }
 0x4b8   : > { %p12_p4 = scmp.ge.s32.totalorder %s15_s15, 4  }
 0x4ba   :  { %14 = sbr.rel (!%p12_p4) target bundleno = 1 (0x1), region = 74 }

</bundles_post_ra>
